<compile_context>
chip_gen: v6e
topology: v6e:2x2x1
jax: 0.10.0
libtpu: 0.0.40
codegen_flags: <defaults>
</compile_context>

<pallas_src>
import jax
import jax.numpy as jnp
from jax import lax
from jax.experimental import pallas as pl
from jax.experimental.pallas import tpu as pltpu


NEG_SLOPE = 0.01
LN_EPS = 1e-5
HID = 128            # per-branch hidden width (fc_s / fc_a outputs)
OUT_PAD = 128        # lane-dense padded output width for fc_out
MAX_TB = 512         # batch-tile cap (multiple of 8; ~2 MiB of intermediates)


def _leaky_relu(x):
    return jnp.where(x >= 0, x, NEG_SLOPE * x)


def qnetwork_kernel(
    x_ref,            # (TB, state_dim)   f32
    a_ref,            # (TB, action_dim)  f32
    ws_ref,           # (state_dim, 128)  bf16
    wa_ref,           # (action_dim, 128) bf16
    w1_ref,           # (256, 256)        bf16
    wo_ref,           # (256, 128)        bf16 (zero-padded fc_out)
    bias_ref,         # (8, 256)          f32  packed bias/gamma/beta rows
    out_ref,          # (TB, 128)         out_dtype
):
    b = bias_ref[...]                              # (8, 256) f32
    b_s,  b_a  = b[0:1, :HID], b[0:1, HID:]
    g_s,  g_a  = b[1:2, :HID], b[1:2, HID:]
    bl_s, bl_a = b[2:3, :HID], b[2:3, HID:]
    b1, g1, bl1 = b[3:4, :], b[4:5, :], b[5:6, :]
    bo = b[6:7, :OUT_PAD]

    def ln_lrelu(h, n, gamma, beta):
        # Clamped E[x^2]-E[x]^2 form: two independent XLU reductions, and
        # var >= 0 even under catastrophic cancellation.
        s = jnp.sum(h, axis=-1, keepdims=True)
        ss = jnp.sum(h * h, axis=-1, keepdims=True)
        mu = s * (1.0 / n)
        var = jnp.maximum(ss * (1.0 / n) - mu * mu, 0.0)
        inv = lax.rsqrt(var + LN_EPS)
        return _leaky_relu((h - mu) * inv * gamma + beta)

    x = x_ref[...].astype(jnp.bfloat16)
    a = a_ref[...].astype(jnp.bfloat16)

    # ---- fc_s / fc_a + ln_s / ln_a, each half normalized independently ----
    h1 = ln_lrelu(jnp.dot(x, ws_ref[...], preferred_element_type=jnp.float32) + b_s,
                  HID, g_s, bl_s)
    h2 = ln_lrelu(jnp.dot(a, wa_ref[...], preferred_element_type=jnp.float32) + b_a,
                  HID, g_a, bl_a)

    # ---- torch.cat at the 128-lane (vreg-aligned) boundary ----
    h = jnp.concatenate([h1, h2], axis=-1).astype(jnp.bfloat16)     # (TB, 256)

    # ---- fc_1 + ln_1 ----
    q = ln_lrelu(jnp.dot(h, w1_ref[...], preferred_element_type=jnp.float32) + b1,
                 2 * HID, g1, bl1)

    # ---- fc_out, zero-padded to 128 lanes -> unmasked full-vreg store ----
    out = jnp.dot(q.astype(jnp.bfloat16), wo_ref[...],
                  preferred_element_type=jnp.float32) + bo
    out_ref[...] = out.astype(out_ref.dtype)


def qnetwork_forward(x, a, kp, action_dim, *, out_dtype=jnp.float32, max_tb=MAX_TB):
    """x: (B, state_dim) f32, a: (B, action_dim) f32 -> (B, action_dim)."""
    B, state_dim = x.shape
    adim_in = a.shape[1]

    # Batch tile: multiple of 8, capped at max_tb; pad B up to a multiple of TB.
    b8 = max(8, 8 * pl.cdiv(B, 8))
    tb = min(b8, max_tb)
    bp = tb * pl.cdiv(b8, tb)
    if bp != B:
        x = jnp.pad(x, ((0, bp - B), (0, 0)))
        a = jnp.pad(a, ((0, bp - B), (0, 0)))

    args = (x, a, kp["ws"], kp["wa"], kp["w1"], kp["wo_pad"], kp["bias"])

    flops = int(2 * bp * (state_dim * HID + adim_in * HID
                          + 2 * HID * 2 * HID + 2 * HID * OUT_PAD))
    bytes_accessed = int(sum(int(v.size) * v.dtype.itemsize for v in args)
                         + bp * OUT_PAD * jnp.dtype(out_dtype).itemsize)

    out = pl.pallas_call(
        qnetwork_kernel,
        out_shape=jax.ShapeDtypeStruct((bp, OUT_PAD), out_dtype),
        grid=(bp // tb,),
        in_specs=[
            pl.BlockSpec((tb, state_dim), lambda i: (i, 0)),
            pl.BlockSpec((tb, adim_in), lambda i: (i, 0)),
            # Weights / packed biases: constant index_map -> VMEM-resident
            # across all batch-grid steps.
            pl.BlockSpec(kp["ws"].shape, lambda i: (0, 0)),
            pl.BlockSpec(kp["wa"].shape, lambda i: (0, 0)),
            pl.BlockSpec(kp["w1"].shape, lambda i: (0, 0)),
            pl.BlockSpec(kp["wo_pad"].shape, lambda i: (0, 0)),
            pl.BlockSpec(kp["bias"].shape, lambda i: (0, 0)),
        ],
        out_specs=pl.BlockSpec((tb, OUT_PAD), lambda i: (i, 0)),
        compiler_params=pltpu.CompilerParams(
            dimension_semantics=("parallel",)),
        cost_estimate=pl.CostEstimate(
            flops=flops, transcendentals=3 * bp, bytes_accessed=bytes_accessed),
    )(*args)
    return out[:B, :action_dim]


def init_params(key, state_dim, action_dim):
    """Raw (torch-semantics) params: Linear weights stored transposed (in, out),
    biases / LN params as (1, N). Mirrors QNetwork._init_weights."""
    ks = jax.random.split(key, 5)
    gain = (2.0 / (1.0 + NEG_SLOPE ** 2)) ** 0.5

    def kaiming(k, fan_in, fan_out):
        std = gain / (fan_in ** 0.5)
        return std * jax.random.normal(k, (fan_in, fan_out), jnp.float32)

    return {
        "ws": kaiming(ks[0], state_dim, HID),
        "bs": jnp.zeros((1, HID), jnp.float32),
        "gs": jnp.ones((1, HID), jnp.float32),
        "bln_s": jnp.zeros((1, HID), jnp.float32),
        "wa": kaiming(ks[1], action_dim, HID),
        "ba": jnp.zeros((1, HID), jnp.float32),
        "ga": jnp.ones((1, HID), jnp.float32),
        "bln_a": jnp.zeros((1, HID), jnp.float32),
        "w1": kaiming(ks[2], 2 * HID, 2 * HID),
        "b1": jnp.zeros((1, 2 * HID), jnp.float32),
        "g1": jnp.ones((1, 2 * HID), jnp.float32),
        "bln_1": jnp.zeros((1, 2 * HID), jnp.float32),
        "wo": jax.random.uniform(ks[3], (2 * HID, action_dim), jnp.float32, -0.003, 0.003),
        "bo": jax.random.uniform(ks[4], (1, action_dim), jnp.float32, -0.003, 0.003),
    }


def pack_params(p, state_dim, action_dim):
    """Build padded / packed / bf16 kernel operands from raw params."""
    # fc_out padded to 128 output lanes (extra lanes exact zeros).
    wo_pad = jnp.zeros((2 * HID, OUT_PAD), jnp.float32).at[:, :action_dim].set(p["wo"])

    # All small per-channel vectors packed into one (8, 256) f32 array:
    #   row 0: [b_s | b_a]   row 1: [g_s | g_a]   row 2: [bln_s | bln_a]
    #   row 3: b_1           row 4: g_1           row 5: bln_1
    #   row 6: bo padded to 128 lanes (in first half); row 7: unused zeros.
    bias = jnp.zeros((8, 2 * HID), jnp.float32)
    bias = bias.at[0, :HID].set(p["bs"][0]).at[0, HID:].set(p["ba"][0])
    bias = bias.at[1, :HID].set(p["gs"][0]).at[1, HID:].set(p["ga"][0])
    bias = bias.at[2, :HID].set(p["bln_s"][0]).at[2, HID:].set(p["bln_a"][0])
    bias = bias.at[3].set(p["b1"][0])
    bias = bias.at[4].set(p["g1"][0])
    bias = bias.at[5].set(p["bln_1"][0])
    bias = bias.at[6, :action_dim].set(p["bo"][0])

    return {
        "ws": p["ws"].astype(jnp.bfloat16),
        "wa": p["wa"].astype(jnp.bfloat16),
        "w1": p["w1"].astype(jnp.bfloat16),
        "wo_pad": wo_pad.astype(jnp.bfloat16),
        "bias": bias,
    }


def reference_forward(x, a, p, mm_dtype=jnp.float32):
    """Pure-JAX reference of the PyTorch forward. With mm_dtype=bfloat16 it
    reproduces the kernel's matmul precision (f32 accumulation)."""
    def mm(u, w):
        return jnp.dot(u.astype(mm_dtype), w.astype(mm_dtype),
                       preferred_element_type=jnp.float32)

    def ln(h, g, b):
        mu = jnp.mean(h, -1, keepdims=True)
        var = jnp.mean((h - mu) ** 2, -1, keepdims=True)
        return (h - mu) / jnp.sqrt(var + LN_EPS) * g + b

    h1 = _leaky_relu(ln(mm(x, p["ws"]) + p["bs"], p["gs"], p["bln_s"]))
    h2 = _leaky_relu(ln(mm(a, p["wa"]) + p["ba"], p["ga"], p["bln_a"]))
    cat = jnp.concatenate([h1, h2], axis=-1)
    q = _leaky_relu(ln(mm(cat, p["w1"]) + p["b1"], p["g1"], p["bln_1"]))
    return mm(q, p["wo"]) + p["bo"]


if __name__ == "__main__":
    key = jax.random.PRNGKey(0)
    k_param, k_x, k_a, k_x2, k_a2 = jax.random.split(key, 5)

    batch, state_dim, action_dim = 8, 16, 4
    raw = init_params(k_param, state_dim, action_dim)
    kp = pack_params(raw, state_dim, action_dim)

    x = jax.random.normal(k_x, (batch, state_dim), jnp.float32)
    a = jax.random.normal(k_a, (batch, action_dim), jnp.float32)

    q = qnetwork_forward(x, a, kp, action_dim)
    jax.block_until_ready(q)
    assert q.shape == (batch, action_dim)

    # Exact-semantics check (same bf16 matmul precision as the kernel).
    q_ref_bf16 = reference_forward(x, a, raw, mm_dtype=jnp.bfloat16)
    assert jnp.allclose(q, q_ref_bf16, atol=1e-3, rtol=1e-3), \
        "mismatch vs bf16-matched reference"

    # Sanity check vs the full-f32 (PyTorch-semantics) forward: only bf16
    # weight/activation rounding separates them.
    q_ref_f32 = reference_forward(x, a, raw, mm_dtype=jnp.float32)
    assert jnp.allclose(q, q_ref_f32, atol=3e-2, rtol=2e-1), \
        "drift vs f32 reference too large"

    # Exercise the multi-step batch grid (3 grid steps, resident weights,
    # non-multiple-of-tile batch padded internally).
    x2 = jax.random.normal(k_x2, (20, state_dim), jnp.float32)
    a2 = jax.random.normal(k_a2, (20, action_dim), jnp.float32)
    q2 = qnetwork_forward(x2, a2, kp, action_dim, max_tb=8)
    jax.block_until_ready(q2)
    q2_ref = reference_forward(x2, a2, raw, mm_dtype=jnp.bfloat16)
    assert q2.shape == (20, action_dim)
    assert jnp.allclose(q2, q2_ref, atol=1e-3, rtol=1e-3), \
        "mismatch on batch-grid path"

    print("KERNEL_OK")
</pallas_src>

<mosaic_0001>
module attributes {stable_mosaic.version = 11 : i64} {
  func.func @qnetwork_kernel(%arg0: i32, %arg1: memref<8x16xf32, #tpu.memory_space<vmem>>, %arg2: memref<8x4xf32, #tpu.memory_space<vmem>>, %arg3: memref<16x128xbf16, #tpu.memory_space<vmem>>, %arg4: memref<4x128xbf16, #tpu.memory_space<vmem>>, %arg5: memref<256x256xbf16, #tpu.memory_space<vmem>>, %arg6: memref<256x128xbf16, #tpu.memory_space<vmem>>, %arg7: memref<8x256xf32, #tpu.memory_space<vmem>>, %arg8: memref<8x128xf32, #tpu.memory_space<vmem>>) attributes {dimension_semantics = [#tpu.dimension_semantics<parallel>], iteration_bounds = array<i64: 1>, scalar_prefetch = 0 : i64, scratch_operands = 0 : i64, tpu.core_type = #tpu.core_type<tc>, window_params = [{transform_indices = @transform_0, window_bounds = array<i64: 8, 16>}, {transform_indices = @transform_1, window_bounds = array<i64: 8, 4>}, {pipeline_mode = #tpu.pipeline_mode<synchronous>, transform_indices = @transform_2, window_bounds = array<i64: 16, 128>}, {pipeline_mode = #tpu.pipeline_mode<synchronous>, transform_indices = @transform_3, window_bounds = array<i64: 4, 128>}, {pipeline_mode = #tpu.pipeline_mode<synchronous>, transform_indices = @transform_4, window_bounds = array<i64: 256, 256>}, {pipeline_mode = #tpu.pipeline_mode<synchronous>, transform_indices = @transform_5, window_bounds = array<i64: 256, 128>}, {pipeline_mode = #tpu.pipeline_mode<synchronous>, transform_indices = @transform_6, window_bounds = array<i64: 8, 256>}, {transform_indices = @transform_7, window_bounds = array<i64: 8, 128>}]} {
    %c0 = arith.constant 0 : index
    %c0_0 = arith.constant 0 : index
    %0 = vector.load %arg7[%c0, %c0_0] : memref<8x256xf32, #tpu.memory_space<vmem>>, vector<8x256xf32>
    %1 = vector.extract_strided_slice %0 {offsets = [0, 0], sizes = [1, 128], strides = [1, 1]} : vector<8x256xf32> to vector<1x128xf32>
    %2 = vector.extract_strided_slice %0 {offsets = [0, 128], sizes = [1, 128], strides = [1, 1]} : vector<8x256xf32> to vector<1x128xf32>
    %3 = vector.extract_strided_slice %0 {offsets = [1, 0], sizes = [1, 128], strides = [1, 1]} : vector<8x256xf32> to vector<1x128xf32>
    %4 = vector.extract_strided_slice %0 {offsets = [1, 128], sizes = [1, 128], strides = [1, 1]} : vector<8x256xf32> to vector<1x128xf32>
    %5 = vector.extract_strided_slice %0 {offsets = [2, 0], sizes = [1, 128], strides = [1, 1]} : vector<8x256xf32> to vector<1x128xf32>
    %6 = vector.extract_strided_slice %0 {offsets = [2, 128], sizes = [1, 128], strides = [1, 1]} : vector<8x256xf32> to vector<1x128xf32>
    %7 = vector.extract_strided_slice %0 {offsets = [3, 0], sizes = [1, 256], strides = [1, 1]} : vector<8x256xf32> to vector<1x256xf32>
    %8 = vector.extract_strided_slice %0 {offsets = [4, 0], sizes = [1, 256], strides = [1, 1]} : vector<8x256xf32> to vector<1x256xf32>
    %9 = vector.extract_strided_slice %0 {offsets = [5, 0], sizes = [1, 256], strides = [1, 1]} : vector<8x256xf32> to vector<1x256xf32>
    %10 = vector.extract_strided_slice %0 {offsets = [6, 0], sizes = [1, 128], strides = [1, 1]} : vector<8x256xf32> to vector<1x128xf32>
    %c0_1 = arith.constant 0 : index
    %c0_2 = arith.constant 0 : index
    %11 = vector.load %arg1[%c0_1, %c0_2] : memref<8x16xf32, #tpu.memory_space<vmem>>, vector<8x16xf32>
    %12 = arith.truncf %11 : vector<8x16xf32> to vector<8x16xbf16>
    %c0_3 = arith.constant 0 : index
    %c0_4 = arith.constant 0 : index
    %13 = vector.load %arg2[%c0_3, %c0_4] : memref<8x4xf32, #tpu.memory_space<vmem>>, vector<8x4xf32>
    %14 = arith.truncf %13 : vector<8x4xf32> to vector<8x4xbf16>
    %c0_5 = arith.constant 0 : index
    %c0_6 = arith.constant 0 : index
    %15 = vector.load %arg3[%c0_5, %c0_6] : memref<16x128xbf16, #tpu.memory_space<vmem>>, vector<16x128xbf16>
    %cst = arith.constant dense<0.000000e+00> : vector<8x128xf32>
    %16 = tpu.matmul %12, %15, %cst {dimension_numbers = #tpu.dot_dimension_numbers<[1], [0], [0], [1], [0, 0, 1, 1], [], []>} : vector<8x16xbf16>, vector<16x128xbf16>, vector<8x128xf32> -> vector<8x128xf32>
    %17 = vector.broadcast %1 : vector<1x128xf32> to vector<8x128xf32>
    %18 = arith.addf %16, %17 : vector<8x128xf32>
    %cst_7 = arith.constant dense<0.000000e+00> : vector<8xf32>
    %19 = vector.multi_reduction <add>, %18, %cst_7 [1] : vector<8x128xf32> to vector<8xf32>
    %20 = vector.shape_cast %19 : vector<8xf32> to vector<8x1xf32>
    %21 = arith.mulf %18, %18 : vector<8x128xf32>
    %cst_8 = arith.constant dense<0.000000e+00> : vector<8xf32>
    %22 = vector.multi_reduction <add>, %21, %cst_8 [1] : vector<8x128xf32> to vector<8xf32>
    %23 = vector.shape_cast %22 : vector<8xf32> to vector<8x1xf32>
    %cst_9 = arith.constant 7.812500e-03 : f32
    %24 = vector.broadcast %cst_9 : f32 to vector<8x1xf32>
    %25 = arith.mulf %20, %24 : vector<8x1xf32>
    %cst_10 = arith.constant 7.812500e-03 : f32
    %26 = vector.broadcast %cst_10 : f32 to vector<8x1xf32>
    %27 = arith.mulf %23, %26 : vector<8x1xf32>
    %28 = arith.mulf %25, %25 : vector<8x1xf32>
    %29 = arith.subf %27, %28 : vector<8x1xf32>
    %cst_11 = arith.constant 0.000000e+00 : f32
    %30 = vector.broadcast %cst_11 : f32 to vector<8x1xf32>
    %31 = arith.maximumf %29, %30 : vector<8x1xf32>
    %cst_12 = arith.constant 9.99999974E-6 : f32
    %32 = vector.broadcast %cst_12 : f32 to vector<8x1xf32>
    %33 = arith.addf %31, %32 : vector<8x1xf32>
    %34 = math.rsqrt %33 : vector<8x1xf32>
    %35 = vector.broadcast %25 : vector<8x1xf32> to vector<8x128xf32>
    %36 = arith.subf %18, %35 : vector<8x128xf32>
    %37 = vector.broadcast %34 : vector<8x1xf32> to vector<8x128xf32>
    %38 = arith.mulf %36, %37 : vector<8x128xf32>
    %39 = vector.broadcast %3 : vector<1x128xf32> to vector<8x128xf32>
    %40 = arith.mulf %38, %39 : vector<8x128xf32>
    %41 = vector.broadcast %5 : vector<1x128xf32> to vector<8x128xf32>
    %42 = arith.addf %40, %41 : vector<8x128xf32>
    %cst_13 = arith.constant 0.000000e+00 : f32
    %43 = vector.broadcast %cst_13 : f32 to vector<8x128xf32>
    %44 = arith.cmpf oge, %42, %43 : vector<8x128xf32>
    %cst_14 = arith.constant 0.00999999977 : f32
    %45 = vector.broadcast %cst_14 : f32 to vector<8x128xf32>
    %46 = arith.mulf %45, %42 : vector<8x128xf32>
    %47 = arith.select %44, %42, %46 : vector<8x128xi1>, vector<8x128xf32>
    %c0_15 = arith.constant 0 : index
    %c0_16 = arith.constant 0 : index
    %48 = vector.load %arg4[%c0_15, %c0_16] : memref<4x128xbf16, #tpu.memory_space<vmem>>, vector<4x128xbf16>
    %cst_17 = arith.constant dense<0.000000e+00> : vector<8x128xf32>
    %49 = tpu.matmul %14, %48, %cst_17 {dimension_numbers = #tpu.dot_dimension_numbers<[1], [0], [0], [1], [0, 0, 1, 1], [], []>} : vector<8x4xbf16>, vector<4x128xbf16>, vector<8x128xf32> -> vector<8x128xf32>
    %50 = vector.broadcast %2 : vector<1x128xf32> to vector<8x128xf32>
    %51 = arith.addf %49, %50 : vector<8x128xf32>
    %cst_18 = arith.constant dense<0.000000e+00> : vector<8xf32>
    %52 = vector.multi_reduction <add>, %51, %cst_18 [1] : vector<8x128xf32> to vector<8xf32>
    %53 = vector.shape_cast %52 : vector<8xf32> to vector<8x1xf32>
    %54 = arith.mulf %51, %51 : vector<8x128xf32>
    %cst_19 = arith.constant dense<0.000000e+00> : vector<8xf32>
    %55 = vector.multi_reduction <add>, %54, %cst_19 [1] : vector<8x128xf32> to vector<8xf32>
    %56 = vector.shape_cast %55 : vector<8xf32> to vector<8x1xf32>
    %cst_20 = arith.constant 7.812500e-03 : f32
    %57 = vector.broadcast %cst_20 : f32 to vector<8x1xf32>
    %58 = arith.mulf %53, %57 : vector<8x1xf32>
    %cst_21 = arith.constant 7.812500e-03 : f32
    %59 = vector.broadcast %cst_21 : f32 to vector<8x1xf32>
    %60 = arith.mulf %56, %59 : vector<8x1xf32>
    %61 = arith.mulf %58, %58 : vector<8x1xf32>
    %62 = arith.subf %60, %61 : vector<8x1xf32>
    %cst_22 = arith.constant 0.000000e+00 : f32
    %63 = vector.broadcast %cst_22 : f32 to vector<8x1xf32>
    %64 = arith.maximumf %62, %63 : vector<8x1xf32>
    %cst_23 = arith.constant 9.99999974E-6 : f32
    %65 = vector.broadcast %cst_23 : f32 to vector<8x1xf32>
    %66 = arith.addf %64, %65 : vector<8x1xf32>
    %67 = math.rsqrt %66 : vector<8x1xf32>
    %68 = vector.broadcast %58 : vector<8x1xf32> to vector<8x128xf32>
    %69 = arith.subf %51, %68 : vector<8x128xf32>
    %70 = vector.broadcast %67 : vector<8x1xf32> to vector<8x128xf32>
    %71 = arith.mulf %69, %70 : vector<8x128xf32>
    %72 = vector.broadcast %4 : vector<1x128xf32> to vector<8x128xf32>
    %73 = arith.mulf %71, %72 : vector<8x128xf32>
    %74 = vector.broadcast %6 : vector<1x128xf32> to vector<8x128xf32>
    %75 = arith.addf %73, %74 : vector<8x128xf32>
    %cst_24 = arith.constant 0.000000e+00 : f32
    %76 = vector.broadcast %cst_24 : f32 to vector<8x128xf32>
    %77 = arith.cmpf oge, %75, %76 : vector<8x128xf32>
    %cst_25 = arith.constant 0.00999999977 : f32
    %78 = vector.broadcast %cst_25 : f32 to vector<8x128xf32>
    %79 = arith.mulf %78, %75 : vector<8x128xf32>
    %80 = arith.select %77, %75, %79 : vector<8x128xi1>, vector<8x128xf32>
    %81 = tpu.concatenate %47, %80 in 1 : vector<8x128xf32>, vector<8x128xf32> -> vector<8x256xf32>
    %82 = arith.truncf %81 : vector<8x256xf32> to vector<8x256xbf16>
    %c0_26 = arith.constant 0 : index
    %c0_27 = arith.constant 0 : index
    %83 = vector.load %arg5[%c0_26, %c0_27] : memref<256x256xbf16, #tpu.memory_space<vmem>>, vector<256x256xbf16>
    %cst_28 = arith.constant dense<0.000000e+00> : vector<8x256xf32>
    %84 = tpu.matmul %82, %83, %cst_28 {dimension_numbers = #tpu.dot_dimension_numbers<[1], [0], [0], [1], [0, 0, 1, 1], [], []>} : vector<8x256xbf16>, vector<256x256xbf16>, vector<8x256xf32> -> vector<8x256xf32>
    %85 = vector.broadcast %7 : vector<1x256xf32> to vector<8x256xf32>
    %86 = arith.addf %84, %85 : vector<8x256xf32>
    %cst_29 = arith.constant dense<0.000000e+00> : vector<8xf32>
    %87 = vector.multi_reduction <add>, %86, %cst_29 [1] : vector<8x256xf32> to vector<8xf32>
    %88 = vector.shape_cast %87 : vector<8xf32> to vector<8x1xf32>
    %89 = arith.mulf %86, %86 : vector<8x256xf32>
    %cst_30 = arith.constant dense<0.000000e+00> : vector<8xf32>
    %90 = vector.multi_reduction <add>, %89, %cst_30 [1] : vector<8x256xf32> to vector<8xf32>
    %91 = vector.shape_cast %90 : vector<8xf32> to vector<8x1xf32>
    %cst_31 = arith.constant 3.906250e-03 : f32
    %92 = vector.broadcast %cst_31 : f32 to vector<8x1xf32>
    %93 = arith.mulf %88, %92 : vector<8x1xf32>
    %cst_32 = arith.constant 3.906250e-03 : f32
    %94 = vector.broadcast %cst_32 : f32 to vector<8x1xf32>
    %95 = arith.mulf %91, %94 : vector<8x1xf32>
    %96 = arith.mulf %93, %93 : vector<8x1xf32>
    %97 = arith.subf %95, %96 : vector<8x1xf32>
    %cst_33 = arith.constant 0.000000e+00 : f32
    %98 = vector.broadcast %cst_33 : f32 to vector<8x1xf32>
    %99 = arith.maximumf %97, %98 : vector<8x1xf32>
    %cst_34 = arith.constant 9.99999974E-6 : f32
    %100 = vector.broadcast %cst_34 : f32 to vector<8x1xf32>
    %101 = arith.addf %99, %100 : vector<8x1xf32>
    %102 = math.rsqrt %101 : vector<8x1xf32>
    %103 = vector.broadcast %93 : vector<8x1xf32> to vector<8x256xf32>
    %104 = arith.subf %86, %103 : vector<8x256xf32>
    %105 = vector.broadcast %102 : vector<8x1xf32> to vector<8x256xf32>
    %106 = arith.mulf %104, %105 : vector<8x256xf32>
    %107 = vector.broadcast %8 : vector<1x256xf32> to vector<8x256xf32>
    %108 = arith.mulf %106, %107 : vector<8x256xf32>
    %109 = vector.broadcast %9 : vector<1x256xf32> to vector<8x256xf32>
    %110 = arith.addf %108, %109 : vector<8x256xf32>
    %cst_35 = arith.constant 0.000000e+00 : f32
    %111 = vector.broadcast %cst_35 : f32 to vector<8x256xf32>
    %112 = arith.cmpf oge, %110, %111 : vector<8x256xf32>
    %cst_36 = arith.constant 0.00999999977 : f32
    %113 = vector.broadcast %cst_36 : f32 to vector<8x256xf32>
    %114 = arith.mulf %113, %110 : vector<8x256xf32>
    %115 = arith.select %112, %110, %114 : vector<8x256xi1>, vector<8x256xf32>
    %116 = arith.truncf %115 : vector<8x256xf32> to vector<8x256xbf16>
    %c0_37 = arith.constant 0 : index
    %c0_38 = arith.constant 0 : index
    %117 = vector.load %arg6[%c0_37, %c0_38] : memref<256x128xbf16, #tpu.memory_space<vmem>>, vector<256x128xbf16>
    %cst_39 = arith.constant dense<0.000000e+00> : vector<8x128xf32>
    %118 = tpu.matmul %116, %117, %cst_39 {dimension_numbers = #tpu.dot_dimension_numbers<[1], [0], [0], [1], [0, 0, 1, 1], [], []>} : vector<8x256xbf16>, vector<256x128xbf16>, vector<8x128xf32> -> vector<8x128xf32>
    %119 = vector.broadcast %10 : vector<1x128xf32> to vector<8x128xf32>
    %120 = arith.addf %118, %119 : vector<8x128xf32>
    %c0_40 = arith.constant 0 : index
    %c0_41 = arith.constant 0 : index
    %121 = vector.load %arg8[%c0_40, %c0_41] : memref<8x128xf32, #tpu.memory_space<vmem>>, vector<8x128xf32>
    tpu.vector_store %arg8[%c0_40, %c0_41], %120 {strides = array<i32>} : memref<8x128xf32, #tpu.memory_space<vmem>>, vector<8x128xf32>,
    return
  }
  func.func @transform_0(%arg0: i32) -> (i32, i32) {
    %c0_i32 = arith.constant 0 : i32
    %c0_i32_0 = arith.constant 0 : i32
    return %arg0, %c0_i32 : i32, i32
  }
  func.func @transform_1(%arg0: i32) -> (i32, i32) {
    %c0_i32 = arith.constant 0 : i32
    %c0_i32_0 = arith.constant 0 : i32
    return %arg0, %c0_i32 : i32, i32
  }
  func.func @transform_2(%arg0: i32) -> (i32, i32) {
    %c0_i32 = arith.constant 0 : i32
    %c0_i32_0 = arith.constant 0 : i32
    %c0_i32_1 = arith.constant 0 : i32
    return %c0_i32, %c0_i32_0 : i32, i32
  }
  func.func @transform_3(%arg0: i32) -> (i32, i32) {
    %c0_i32 = arith.constant 0 : i32
    %c0_i32_0 = arith.constant 0 : i32
    %c0_i32_1 = arith.constant 0 : i32
    return %c0_i32, %c0_i32_0 : i32, i32
  }
  func.func @transform_4(%arg0: i32) -> (i32, i32) {
    %c0_i32 = arith.constant 0 : i32
    %c0_i32_0 = arith.constant 0 : i32
    %c0_i32_1 = arith.constant 0 : i32
    return %c0_i32, %c0_i32_0 : i32, i32
  }
  func.func @transform_5(%arg0: i32) -> (i32, i32) {
    %c0_i32 = arith.constant 0 : i32
    %c0_i32_0 = arith.constant 0 : i32
    %c0_i32_1 = arith.constant 0 : i32
    return %c0_i32, %c0_i32_0 : i32, i32
  }
  func.func @transform_6(%arg0: i32) -> (i32, i32) {
    %c0_i32 = arith.constant 0 : i32
    %c0_i32_0 = arith.constant 0 : i32
    %c0_i32_1 = arith.constant 0 : i32
    return %c0_i32, %c0_i32_0 : i32, i32
  }
  func.func @transform_7(%arg0: i32) -> (i32, i32) {
    %c0_i32 = arith.constant 0 : i32
    %c0_i32_0 = arith.constant 0 : i32
    return %arg0, %c0_i32 : i32, i32
  }
}

</mosaic_0001>

<bundles_post_ra>
// kernel: tpu_custom_call.1
= control target key start
LH: loop header
LB: loop body
LE: loop exit
PB: predicated region body
PF: predicated region fallthrough
CT: control target
= control target key end

     0   :  { %12 = vsyncpa [#allocation3], 0  ;;  %s1131_s0 = inlined_call_operand.hbm [shape: f32[8,16], index: 0, kind: input, shape index: {}]   ;;  %s1132_s1 = inlined_call_operand.vmem [shape: f32[8,4], index: 1, kind: input, shape index: {}]   ;;  %s1133_s2 = inlined_call_operand.hbm [shape: bf16[16,128], index: 2, kind: input, shape index: {}]   ;;  %s1134_s3 = inlined_call_operand.vmem [shape: bf16[4,128], index: 3, kind: input, shape index: {}]   ;;  %s1135_s4 = inlined_call_operand.hbm [shape: bf16[256,256], index: 4, kind: input, shape index: {}]   ;;  %s1136_s5 = inlined_call_operand.hbm [shape: bf16[256,128], index: 5, kind: input, shape index: {}]   ;;  %s1137_s6 = inlined_call_operand.vmem [shape: f32[8,256], index: 6, kind: input, shape index: {}]   ;;  %s1138_s7 = inlined_call_operand.hbm [shape: f32[8,128], index: 7, kind: output, shape index: {}]  }
   0x1   :  { %13 = vsyncpa [#allocation6], 0 }
   0x2   :  { %14 = vsyncpa [#allocation9], 0 }
   0x3   :  { %15 = vsyncpa [#allocation4], 0  ;;  %s1009_s24 = smov [#allocation5]  }
   0x4   :  { %s33_s25 = sshll.u32 %s1009_s24, 4  ;;  %s34_s25 = int_to_ptr.vmem [resolvable:$true] %s33_s25 }
   0x5   :  { %s909_s26 = scalar_lea.vmem %s34_s25, 128  ;;  %p914_p1 = scmp.lt.s32.totalorder %s34_s25, %s34_s25 }
   0x6   :  { %p910_p0 = scmp.ne.s32.totalorder %s34_s25, %s909_s26  ;;  %p915_p2 = scmp.lt.s32.totalorder %s909_s26, %s909_s26 }
   0x8   :  { %p916_p3 = por %p915_p2, %p914_p1 }
   0xa   :  { %p917_p4 = pnand %p916_p3, %p910_p0 }
   0xc   :  { %920 = shalt.err (!%p917_p4)
}
   0xd   :  { %s1010_s27 = smov 64   ;;  %s1011_s28 = smov 4  }
   0xe   :  { %39 = dma.hbm_to_vmem [thread:$0]  %s1133_s2, 128, %s34_s25, [#allocation6], %s1010_s27, %s1010_s27, %s1011_s28  }
   0xf   :  { %s1012_s8 = smov [#allocation2]   ;;  %s1013_s10 = smov [#allocation7]  }
  0x10   :  { %s22_s9 = sshll.u32 %s1012_s8, 4  ;;  %s47_s11 = sshll.u32 %s1013_s10, 4  ;;  %s23_s9 = int_to_ptr.vmem [resolvable:$true] %s22_s9  ;;  %s48_s11 = int_to_ptr.vmem [resolvable:$true] %s47_s11 }
  0x11   :  { %s929_s12 = scalar_lea.vmem %s23_s9, 128  ;;  %p934_p6 = scmp.lt.s32.totalorder %s23_s9, %s23_s9 }
  0x12   :  { %p930_p5 = scmp.ne.s32.totalorder %s23_s9, %s929_s12  ;;  %p935_p7 = scmp.lt.s32.totalorder %s929_s12, %s929_s12 }
  0x14   :  { %p936_p8 = por %p935_p7, %p934_p6 }
  0x16   :  { %p937_p9 = pnand %p936_p8, %p930_p5 }
  0x18   :  { %940 = shalt.err (!%p937_p9)
}
  0x19   :  { %25 = dma.hbm_to_vmem [thread:$0]  %s1131_s0, 128, %s23_s9, [#allocation3]  }
  0x1a   :  { %s949_s15 = scalar_lea.vmem %s48_s11, 4096  ;;  %p954_p11 = scmp.lt.s32.totalorder %s48_s11, %s48_s11 }
  0x1b   :  { %p950_p10 = scmp.ne.s32.totalorder %s48_s11, %s949_s15  ;;  %p955_p12 = scmp.lt.s32.totalorder %s949_s15, %s949_s15 }
  0x1d   :  { %p956_p13 = por %p955_p12, %p954_p11 }
  0x1f   :  { %p957_p0 = pnand %p956_p13, %p950_p10 }
  0x21   :  { %960 = shalt.err (!%p957_p0)
}
  0x22   :  { %s1014_s2 = smov 128   ;;  %s1015_s16 = smov 8  }
  0x23   :  { %53 = dma.hbm_to_vmem [thread:$0]  %s1135_s4, 4096, %s48_s11, [#allocation6], %s1014_s2, %s1014_s2, %s1015_s16  }
  0x24   :  { %s1016_s19 = smov [#allocation8]  }
  0x25   :  { %s59_s20 = sshll.u32 %s1016_s19, 4  ;;  %s60_s20 = int_to_ptr.vmem [resolvable:$true] %s59_s20 }
  0x26   :  { %s969_s21 = scalar_lea.vmem %s60_s20, 2048  ;;  %p974_p2 = scmp.lt.s32.totalorder %s60_s20, %s60_s20 }
  0x27   :  { %p970_p1 = scmp.ne.s32.totalorder %s60_s20, %s969_s21  ;;  %p975_p3 = scmp.lt.s32.totalorder %s969_s21, %s969_s21 }
  0x29   :  { %p976_p4 = por %p975_p3, %p974_p2 }
  0x2b   :  { %p977_p5 = pnand %p976_p4, %p970_p1 }
  0x2d   :  { %980 = shalt.err (!%p977_p5)
}
  0x2e   :  { %65 = dma.hbm_to_vmem [thread:$0]  %s1136_s5, 2048, %s60_s20, [#allocation9], %s1010_s27, %s1010_s27, %s1011_s28  }
  0x2f   :  { %1001 = dma.done.wait [#allocation3], 128  }
  0x30   :  { %1002 = vsyncadd [#allocation3], 4294967168 }
  0x31   :  { %1003 = dma.done.wait [#allocation6], 4224  }
  0x32   :  { %1004 = vsyncadd [#allocation6], 4294963072 }
  0x33   :  { %1005 = dma.done.wait [#allocation9], 2048  }
  0x34   :  { %1006 = vsyncadd [#allocation9], 4294965248  ;;  %v1017_v0 = vmov 0.0   ;;  %vm1018_vm0 = vmmov 0   ;;  %v830_v1 = vld [vmem:[#allocation5] sm:$0xff]   ;;  %vm179_vm1 = vcmask 1041408   ;;  %v89_v21 = vlaneseq }
  0x35   :  { %807 = vmatprep.subr.bf16.mxu1 %v1017_v0  ;;  %809 = vmatprep.mubr.msk.bf16.mxu1 %vm1018_vm0, %v1017_v0  ;;  %v83_v2 = vld [vmem:[#allocation2] sm:$0xff]  ;;  %vm99_vm2 = vcmask 130048   ;;  %vm175_vm3 = vcmask 31744   ;;  %v834_v10 = vld [vmem:[#allocation7 + $0x64] ss:$8 sps:$4 sm:$0xff]   ;;  %v1089_v25 = vld [vmem:[%s1137_s6 + $0x8] sm:$0xff] }
  0x36   :  { %v170_v3 = vld [vmem:[%s1134_s3] sm:$0x3]  ;;  %808 = vmatpush3.bf16.msra.mxu1 %v830_v1  ;;  %v84_v4 = vpack.c.bf16 %v83_v2, %v83_v2  ;;  %v831_v8 = vld [vmem:[#allocation7 + $0x74] ss:$8 sps:$4 sm:$0xff]   ;;  %v836_v11 = vld [vmem:[#allocation7 + $0x60] ss:$8 sps:$4 sm:$0xff]  }
  0x37   :  { %813 = vmatprep.subr.bf16.mxu1 %v1017_v0  ;;  %v181_v5 = vsel %vm179_vm1, %v170_v3, 0  ;;  %v85_v6 = vld [vmem:[%s1132_s1] sm:$0xff]  ;;  %452 = vmatprep.subr.bf16.mxu0 %v831_v8  ;;  %v840_v14 = vld [vmem:[#allocation7 + $0x44] ss:$8 sps:$4 sm:$0xff]   ;;  %v842_v15 = vld [vmem:[#allocation7 + $0x40] ss:$8 sps:$4 sm:$0xff]  }
  0x38   :  { %v86_v7 = vpack.c.bf16 %v85_v6, %v85_v6  ;;  %v833_v9 = vld [vmem:[#allocation7 + $0x70] ss:$8 sps:$4 sm:$0xff]   ;;  %v837_v12 = vld [vmem:[#allocation7 + $0x54] ss:$8 sps:$4 sm:$0xff]   ;;  %v846_v18 = vld [vmem:[#allocation7 + $0x24] ss:$8 sps:$4 sm:$0xff]  }
  0x39   :  { %810 = vmatmul.mubr.msk.bf16.vlgmr.msra.gmra.mxu1 %vm99_vm2, %v84_v4  ;;  %453 = vmatpush1.bf16.msra.mxu0 %v833_v9  ;;  %v839_v13 = vld [vmem:[#allocation7 + $0x50] ss:$8 sps:$4 sm:$0xff]   ;;  %v843_v16 = vld [vmem:[#allocation7 + $0x34] ss:$8 sps:$4 sm:$0xff]   ;;  %v848_v19 = vld [vmem:[#allocation7 + $0x20] ss:$8 sps:$4 sm:$0xff]  }
  0x3a   :  { %814 = vmatpush3.bf16.msra.mxu1 %v181_v5  ;;  %815 = vmatprep.mubr.msk.bf16.mxu1 %vm1018_vm0, %v1017_v0  ;;  %v845_v17 = vld [vmem:[#allocation7 + $0x30] ss:$8 sps:$4 sm:$0xff]   ;;  %v849_v20 = vld [vmem:[#allocation7 + $0x14] ss:$8 sps:$4 sm:$0xff]   ;;  %v1084_v22 = vshrl.u32 %v89_v21, 7 }
  0x3b   :  { %454 = vmatprep.subr.bf16.mxu0 %v834_v10  ;;  %v1095_v27 = vld [vmem:[%s1137_s6] sm:$0xff]  ;;  %v852_v41 = vld [vmem:[#allocation7 + $0x4] ss:$8 sps:$4 sm:$0xff]   ;;  %v854_v42 = vld [vmem:[#allocation7] ss:$8 sps:$4 sm:$0xff]   ;;  %s1019_s6 = smov [#allocation10]  }
  0x3c   :  { %v91_v26 = vsub.s32 0, %v1084_v22  ;;  %v851_v40 = vld [vmem:[#allocation7 + $0x10] ss:$8 sps:$4 sm:$0xff]   ;;  %v855_v43 = vld [vmem:[#allocation7 + $0xf4] ss:$8 sps:$4 sm:$0xff]   ;;  %s719_s27 = sshll.u32 %s1019_s6, 4  ;;  %s720_s27 = int_to_ptr.vmem [resolvable:$true] %s719_s27 }
  0x3d   :  { %455 = vmatpush1.bf16.msra.mxu0 %v836_v11  ;;  %v857_v44 = vld [vmem:[#allocation7 + $0xf0] ss:$8 sps:$4 sm:$0xff]   ;;  %v858_v45 = vld [vmem:[#allocation7 + $0xe4] ss:$8 sps:$4 sm:$0xff]   ;;  %v860_v46 = vld [vmem:[#allocation7 + $0xe0] ss:$8 sps:$4 sm:$0xff]   ;;  %p986_p7 = scmp.lt.s32.totalorder %s720_s27, %s720_s27 }
  0x3e   :  { %456 = vmatprep.subr.bf16.mxu0 %v837_v12  ;;  %v174_v29 = vrot.slane %v1089_v25, %v91_v26  ;;  %v92_v31 = vrot.slane %v1095_v27, %v91_v26  ;;  %v861_v47 = vld [vmem:[#allocation7 + $0xd4] ss:$8 sps:$4 sm:$0xff]   ;;  %v863_v48 = vld [vmem:[#allocation7 + $0xd0] ss:$8 sps:$4 sm:$0xff]   ;;  %v864_v49 = vld [vmem:[#allocation7 + $0xc4] ss:$8 sps:$4 sm:$0xff]  }
  0x3f   :  { %v866_v50 = vld [vmem:[#allocation7 + $0xc0] ss:$8 sps:$4 sm:$0xff]   ;;  %v867_v51 = vld [vmem:[#allocation7 + $0xb4] ss:$8 sps:$4 sm:$0xff]   ;;  %v869_v52 = vld [vmem:[#allocation7 + $0xb0] ss:$8 sps:$4 sm:$0xff]  }
  0x40   :  { %v870_v53 = vld [vmem:[#allocation7 + $0xa4] ss:$8 sps:$4 sm:$0xff]   ;;  %v872_v54 = vld [vmem:[#allocation7 + $0xa0] ss:$8 sps:$4 sm:$0xff]   ;;  %v873_v55 = vld [vmem:[#allocation7 + $0x94] ss:$8 sps:$4 sm:$0xff]  }
  0x41   :  { %816 = vmatmul.mubr.msk.bf16.vlgmr.msra.gmra.mxu1 %vm175_vm3, %v86_v7  ;;  %457 = vmatpush1.bf16.msra.mxu0 %v839_v13  ;;  %v875_v56 = vld [vmem:[#allocation7 + $0x90] ss:$8 sps:$4 sm:$0xff]   ;;  %v876_v57 = vld [vmem:[#allocation7 + $0x84] ss:$8 sps:$4 sm:$0xff]   ;;  %v878_v58 = vld [vmem:[#allocation7 + $0x80] ss:$8 sps:$4 sm:$0xff]  }
  0x42   :  { %458 = vmatprep.subr.bf16.mxu0 %v840_v14  ;;  %v159_v11 = vsub.s32 1, %v1084_v22  ;;  %v164_v12 = vsub.s32 2, %v1084_v22  ;;  %s981_s28 = scalar_lea.vmem %s720_s27, 128 }
  0x43   :  { %p982_p6 = scmp.ne.s32.totalorder %s720_s27, %s981_s28  ;;  %p987_p8 = scmp.lt.s32.totalorder %s981_s28, %s981_s28 }
  0x44   :  { %v240_v14 = vrot.slane %v1089_v25, %v159_v11  ;;  %v165_v26 = vrot.slane %v1095_v27, %v164_v12 }
  0x45   :  { %459 = vmatpush1.bf16.msra.mxu0 %v842_v15  ;;  %p988_p9 = por %p987_p8, %p986_p7 }
  0x46   :  { %460 = vmatprep.subr.bf16.mxu0 %v843_v16 }
  0x47   :  { %p989_p10 = pnand %p988_p9, %p982_p6 }
  0x49   :  { %461 = vmatpush1.bf16.msra.mxu0 %v845_v17  ;;  %v245_v17 = vrot.slane %v1089_v25, %v164_v12 }
  0x4a   :  { %462 = vmatprep.subr.bf16.mxu0 %v846_v18 }
  0x4d   :  { %463 = vmatpush1.bf16.msra.mxu0 %v848_v19 }
  0x4e   :  { %464 = vmatprep.subr.bf16.mxu0 %v849_v20  ;;  %v160_v20 = vrot.slane %v1095_v27, %v159_v11 }
  0x51   :  { %465 = vmatpush1.bf16.msra.mxu0 %v851_v40 }
  0x52   :  { %466 = vmatprep.subr.bf16.mxu0 %v852_v41 }
  0x55   :  { %467 = vmatpush1.bf16.msra.mxu0 %v854_v42 }
  0x56   :  { %468 = vmatprep.subr.bf16.mxu0 %v855_v43 }
  0x59   :  { %469 = vmatpush2.bf16.msra.mxu0 %v857_v44 }
  0x5a   :  { %470 = vmatprep.subr.bf16.mxu0 %v858_v45 }
  0x5d   :  { %471 = vmatpush2.bf16.msra.mxu0 %v860_v46 }
  0x5e   :  { %472 = vmatprep.subr.bf16.mxu0 %v861_v47 }
  0x61   :  { %473 = vmatpush2.bf16.msra.mxu0 %v863_v48 }
  0x62   :  { %474 = vmatprep.subr.bf16.mxu0 %v864_v49  ;;  %v879_v49 = vld [vmem:[#allocation8 + $0x78] sm:$0xff]  }
  0x63   :  { %785 = vmatprep.subr.bf16.mxu1 %v879_v49 }
  0x65   :  { %475 = vmatpush2.bf16.msra.mxu0 %v866_v50  ;;  %v880_v50 = vld [vmem:[#allocation8 + $0x38] sm:$0xff]  }
  0x66   :  { %476 = vmatprep.subr.bf16.mxu0 %v867_v51  ;;  %786 = vmatpush3.bf16.msra.mxu1 %v880_v50  ;;  %v881_v51 = vld [vmem:[#allocation8 + $0x70] sm:$0xff]  }
  0x67   :  { %787 = vmatprep.subr.bf16.mxu1 %v881_v51 }
  0x69   :  { %477 = vmatpush2.bf16.msra.mxu0 %v869_v52  ;;  %v882_v52 = vld [vmem:[#allocation8 + $0x30] sm:$0xff]  }
  0x6a   :  { %478 = vmatprep.subr.bf16.mxu0 %v870_v53  ;;  %788 = vmatpush3.bf16.msra.mxu1 %v882_v52  ;;  %v883_v53 = vld [vmem:[#allocation8 + $0x68] sm:$0xff]  }
  0x6b   :  { %789 = vmatprep.subr.bf16.mxu1 %v883_v53 }
  0x6d   :  { %479 = vmatpush2.bf16.msra.mxu0 %v872_v54  ;;  %v884_v54 = vld [vmem:[#allocation8 + $0x28] sm:$0xff]  }
  0x6e   :  { %480 = vmatprep.subr.bf16.mxu0 %v873_v55  ;;  %v885_v55 = vld [vmem:[#allocation8 + $0x60] sm:$0xff]   ;;  %790 = vmatpush3.bf16.msra.mxu1 %v884_v54 }
  0x6f   :  { %791 = vmatprep.subr.bf16.mxu1 %v885_v55 }
  0x71   :  { %481 = vmatpush2.bf16.msra.mxu0 %v875_v56  ;;  %v886_v56 = vld [vmem:[#allocation8 + $0x20] sm:$0xff]  }
  0x72   :  { %482 = vmatprep.subr.bf16.mxu0 %v876_v57  ;;  %v887_v57 = vld [vmem:[#allocation8 + $0x58] sm:$0xff]   ;;  %792 = vmatpush3.bf16.msra.mxu1 %v886_v56 }
  0x73   :  { %793 = vmatprep.subr.bf16.mxu1 %v887_v57 }
  0x75   :  { %483 = vmatpush2.bf16.msra.mxu0 %v878_v58  ;;  %v888_v58 = vld [vmem:[#allocation8 + $0x18] sm:$0xff]  }
  0x76   :  { %794 = vmatpush3.bf16.msra.mxu1 %v888_v58 }
  0xf9   :  { %v137_v23 = vpop.f32.mrf.mxu1 }
  0xfa   :  { %v1101_v35 = vadd.f32 %v137_v23, %v92_v31 }
  0xfb   :  { %v811_v24 = vpop.f32.mrf.mxu1 }
  0xfc   :  { %v145_v39 = vmul.f32 %v1101_v35, %v1101_v35 }
  0xfd   :  { %v140_v28 = vpop.f32.mrf.mxu1 }
  0xff   :  { %v812_v30 = vpop.f32.mrf.mxu1 }
 0x101   :  { %v217_v32 = vpop.f32.mrf.mxu1 }
 0x102   :  { %v1099_v33 = vadd.f32 %v217_v32, %v174_v29 }
 0x103   :  { %v817_v34 = vpop.f32.mrf.mxu1 }
 0x104   :  { %223 = vadd.xlane.f32.xlu0 %v1099_v33  ;;  %v225_v36 = vmul.f32 %v1099_v33, %v1099_v33 }
 0x105   :  { %v220_v37 = vpop.f32.mrf.mxu1 }
 0x106   :  { %226 = vadd.xlane.f32.xlu1 %v225_v36 }
 0x107   :  { %v818_v38 = vpop.f32.mrf.mxu1 }
 0x108   :  { %143 = vadd.xlane.f32.xlu0 %v1101_v35 }
 0x10a   :  { %146 = vadd.xlane.f32.xlu1 %v145_v39 }
 0x18d   :  { %v224_v59 = vpop.xlane.xlu0 %223 }
 0x18e   :  { %v228_v60 = vmul.f32 0.0078125, %v224_v59  ;;  %v889_v59 = vld [vmem:[#allocation8 + $0x50] sm:$0xff]  }
 0x18f   :  { %v227_v61 = vpop.xlane.xlu1 %226  ;;  %795 = vmatprep.subr.bf16.mxu1 %v889_v59 }
 0x190   :  { %v230_v62 = vmul.f32 %v228_v60, %v228_v60  ;;  %v229_v63 = vmul.f32 0.0078125, %v227_v61  ;;  %v235_v13 = vsub.f32 %v1099_v33, %v228_v60  ;;  %v890_v60 = vld [vmem:[#allocation8 + $0x10] sm:$0xff]   ;;  %v891_v61 = vld [vmem:[#allocation8 + $0x48] sm:$0xff]  }
 0x191   :  { %v144_v0 = vpop.xlane.xlu0 %143  ;;  %796 = vmatpush3.bf16.msra.mxu1 %v890_v60 }
 0x192   :  { %v231_v1 = vsub.f32 %v229_v63, %v230_v62  ;;  %v148_v2 = vmul.f32 0.0078125, %v144_v0  ;;  %v892_v62 = vld [vmem:[#allocation8 + $0x8] sm:$0xff]   ;;  %797 = vmatprep.subr.bf16.mxu1 %v891_v61  ;;  %v893_v63 = vld [vmem:[#allocation8 + $0x40] sm:$0xff]  }
 0x193   :  { %v147_v3 = vpop.xlane.xlu1 %146  ;;  %v894_v0 = vld [vmem:[#allocation8] sm:$0xff]  }
 0x194   :  { %v232_v4 = vmax.f32 %v231_v1, 0.0  ;;  %v150_v5 = vmul.f32 %v148_v2, %v148_v2  ;;  %v149_v6 = vmul.f32 0.0078125, %v147_v3  ;;  %v155_v18 = vsub.f32 %v1101_v35, %v148_v2 }
 0x195   :  { %v286_v35 = vsub.s32 3, %v1084_v22  ;;  %798 = vmatpush3.bf16.msra.mxu1 %v892_v62 }
 0x196   :  { %v233_v7 = vadd.f32 1e-05, %v232_v4  ;;  %v151_v8 = vsub.f32 %v149_v6, %v150_v5  ;;  %799 = vmatprep.subr.bf16.mxu1 %v893_v63 }
 0x197   :  { %v287_v37 = vrot.slane %v1095_v27, %v286_v35  ;;  %v291_v38 = vrot.slane %v1089_v25, %v286_v35 }
 0x198   :  { %895 = vrsqrt.f32 %v233_v7  ;;  %v152_v9 = vmax.f32 %v151_v8, 0.0 }
 0x199   :  { %800 = vmatpush3.bf16.msra.mxu1 %v894_v0 }
 0x19a   :  { %v153_v10 = vadd.f32 1e-05, %v152_v9  ;;  %v514_v9 = vsub.s32 4, %v1084_v22 }
 0x19c   :  { %897 = vrsqrt.f32 %v153_v10  ;;  %v524_v10 = vsub.s32 5, %v1084_v22 }
 0x1a5   :  { %v896_v15 = vpop.eup %895 }
 0x1a6   :  { %v236_v16 = vmul.f32 %v896_v15, %v235_v13  ;;  %v519_v13 = vrot.slane %v1089_v25, %v514_v9 }
 0x1a8   :  { %v241_v19 = vmul.f32 %v240_v14, %v236_v16  ;;  %v515_v14 = vrot.slane %v1095_v27, %v514_v9 }
 0x1a9   :  { %v898_v21 = vpop.eup %897 }
 0x1aa   :  { %v246_v23 = vadd.f32 %v245_v17, %v241_v19  ;;  %v156_v24 = vmul.f32 %v898_v21, %v155_v18  ;;  %v529_v17 = vrot.slane %v1089_v25, %v524_v10  ;;  %v525_v19 = vrot.slane %v1095_v27, %v524_v10 }
 0x1ac   :  { %vm247_vm4 = vcmp.ge.f32.partialorder %v246_v23, 0.0  ;;  %v248_v28 = vmul.f32 0.01, %v246_v23  ;;  %v161_v29 = vmul.f32 %v160_v20, %v156_v24 }
 0x1ae   :  { %v249_v30 = vsel %vm247_vm4, %v246_v23, %v248_v28  ;;  %v166_v31 = vadd.f32 %v165_v26, %v161_v29 }
 0x1af   :  { %v251_v32 = vpack.c.bf16 %v249_v30, %v249_v30 }
 0x1b0   :  { %vm167_vm5 = vcmp.ge.f32.partialorder %v166_v31, 0.0  ;;  %v168_v33 = vmul.f32 0.01, %v166_v31 }
 0x1b1   :  { %484 = vmatprep.mubr.bf16.mxu0 %v251_v32 }
 0x1b2   :  { %v169_v34 = vsel %vm167_vm5, %v166_v31, %v168_v33  ;;  %v574_v33 = vsub.s32 6, %v1084_v22 }
 0x1b3   :  { %v250_v36 = vpack.c.bf16 %v169_v34, %v169_v34 }
 0x1b4   :  { %v575_v34 = vrot.slane %v1095_v27, %v574_v33 }
 0x1b5   :  { %485 = vmatmul.mubr.bf16.vlgmr.msra.gmra.mxu0 %v250_v36 }
 0x275   :  { %v486_v39 = vpop.f32.mrf.mxu0 }
 0x276   :  { %v487_v40 = vadd.f32 %v486_v39, %v287_v37 }
 0x277   :  { %v488_v41 = vpop.f32.mrf.mxu0 }
 0x278   :  { %v489_v42 = vadd.f32 %v488_v41, %v291_v38  ;;  %v496_v45 = vmul.f32 %v487_v40, %v487_v40 }
 0x279   :  { %v490_v43 = vpop.f32.mrf.mxu0 }
 0x27a   :  { %v493_v44 = vadd.f32 %v489_v42, %v487_v40  ;;  %v497_v46 = vmul.f32 %v489_v42, %v489_v42 }
 0x27b   :  { %v491_v47 = vpop.f32.mrf.mxu0 }
 0x27c   :  { %494 = vadd.xlane.f32.xlu0 %v493_v44  ;;  %v498_v48 = vadd.f32 %v497_v46, %v496_v45 }
 0x27e   :  { %499 = vadd.xlane.f32.xlu1 %v498_v48 }
 0x305   :  { %v495_v1 = vpop.xlane.xlu0 %494 }
 0x306   :  { %v501_v2 = vmul.f32 0.00390625, %v495_v1 }
 0x307   :  { %v500_v3 = vpop.xlane.xlu1 %499 }
 0x308   :  { %v502_v4 = vmul.f32 0.00390625, %v500_v3  ;;  %v503_v5 = vmul.f32 %v501_v2, %v501_v2  ;;  %v508_v11 = vsub.f32 %v487_v40, %v501_v2  ;;  %v509_v12 = vsub.f32 %v489_v42, %v501_v2 }
 0x30a   :  { %v504_v6 = vsub.f32 %v502_v4, %v503_v5 }
 0x30c   :  { %v505_v7 = vmax.f32 %v504_v6, 0.0 }
 0x30e   :  { %v506_v8 = vadd.f32 1e-05, %v505_v7 }
 0x310   :  { %899 = vrsqrt.f32 %v506_v8 }
 0x31d   :  { %v900_v15 = vpop.eup %899 }
 0x31e   :  { %v511_v16 = vmul.f32 %v900_v15, %v509_v12  ;;  %v510_v18 = vmul.f32 %v900_v15, %v508_v11 }
 0x320   :  { %v521_v20 = vmul.f32 %v519_v13, %v511_v16  ;;  %v520_v21 = vmul.f32 %v515_v14, %v510_v18 }
 0x322   :  { %v531_v23 = vadd.f32 %v529_v17, %v521_v20  ;;  %v530_v24 = vadd.f32 %v525_v19, %v520_v21 }
 0x324   :  { %vm533_vm6 = vcmp.ge.f32.partialorder %v531_v23, 0.0  ;;  %v535_v26 = vmul.f32 0.01, %v531_v23  ;;  %vm532_vm7 = vcmp.ge.f32.partialorder %v530_v24, 0.0  ;;  %v534_v28 = vmul.f32 0.01, %v530_v24 }
 0x326   :  { %v537_v29 = vsel %vm533_vm6, %v531_v23, %v535_v26  ;;  %v536_v30 = vsel %vm532_vm7, %v530_v24, %v534_v28 }
 0x327   :  { %v539_v31 = vpack.c.bf16 %v537_v29, %v537_v29  ;;  %v538_v32 = vpack.c.bf16 %v536_v30, %v536_v30 }
 0x329   :  { %704 = vmatprep.mubr.bf16.mxu1 %v539_v31 }
 0x32a   :  { %705 = vmatmul.mubr.bf16.vlgmr.msra.gmra.mxu1 %v538_v32 }
 0x3ea   :  { %v801_v25 = vpop.f32.mrf.mxu1 }
 0x3ec   :  { %v802_v36 = vpop.f32.mrf.mxu1 }
 0x3ed   :  { %v803_v35 = vadd.f32 %v802_v36, %v801_v25 }
 0x3ee   :  { %v804_v37 = vpop.f32.mrf.mxu1 }
 0x3ef   :  { %v707_v38 = vadd.f32 %v803_v35, %v575_v34 }
 0x3f0   :  { %v805_v39 = vpop.f32.mrf.mxu1 }
 0x3f1   :  { %712 = vst [vmem:[#allocation10] sm:$0xff] %v707_v38 }
 0x3f2   :  { %992 = shalt.err (!%p989_p10)
}
 0x3f3   :  { %722 = dma.vmem_to_hbm [thread:$0]  %s720_s27, 128, %s1138_s7, [#allocation4]  }
 0x3f4   :  { %1007 = dma.done.wait [#allocation4], 128  }
 0x3f5   :  { %1008 = vsyncadd [#allocation4], 4294967168 }
 0x3f6   :  { %726 = vsyncpa [#allocation3], 1 }
 0x3f7   :  { %727 = vsyncpa [#allocation6], 1 }
 0x3f8   :  { %728 = vsyncpa [#allocation9], 1 }
 0x3f9   :  { %729 = vsyncpa [#allocation4], 1 }

</bundles_post_ra>
